<compile_context>
chip_gen: v5e
topology: v5e:2x2
jax: 0.10.0
libtpu: 0.0.40
codegen_flags: <defaults>
</compile_context>

<pallas_src>
import functools

import jax
import jax.numpy as jnp
from jax.experimental import pallas as pl
from jax.experimental.pallas import tpu as pltpu


def _round_up(x, m):
    return (x + m - 1) // m * m


def _choose_row_tile(rows):
    # Prefer 256-row tiles for pipelining; make sure we get >=2 grid steps on
    # the parallel row axis when possible (megacore / v7x 2-TC sharding).
    for t in (512, 256, 128, 64, 32, 16, 8):
        if rows % t == 0 and rows // t >= 2:
            return t
    return _round_up(rows, 8)  # tiny problem: single (sublane-aligned) tile


def _choose_inner_tile(dim, prefs):
    for p in prefs:
        if dim % p == 0:
            return p
    return dim  # full-extent block (always legal per BlockSpec rules)


def _linear_kernel(x_ref, w_ref, b_ref, o_ref, acc_ref, *, apply_relu):
    # grid = (M tiles, N tiles, K tiles); K is the reduction ("arbitrary") axis.
    k = pl.program_id(2)

    @pl.when(k == 0)
    def _():
        acc_ref[...] = jnp.zeros_like(acc_ref)

    # Operands stay in their native dtype (bf16 stays bf16 -> MXU peak);
    # accumulation is f32 via preferred_element_type.
    acc_ref[...] += jnp.dot(x_ref[...], w_ref[...],
                            preferred_element_type=jnp.float32)

    @pl.when(k == pl.num_programs(2) - 1)
    def _():
        out = acc_ref[...] + b_ref[...].astype(jnp.float32)
        if apply_relu:
            out = jnp.maximum(out, 0.0)
        o_ref[...] = out.astype(o_ref.dtype)


def _linear_pallas(x2, w, b, *, apply_relu):
    """x2: (R, K) @ w: (K, N) + b: (N,), optional ReLU.  Returns (R, N)."""
    R, K = x2.shape
    N = w.shape[1]

    tm = _choose_row_tile(R)
    Rp = _round_up(R, tm)
    if Rp != R:
        x2 = jnp.pad(x2, ((0, Rp - R), (0, 0)))  # padded rows sliced off below

    # N tiles: 256-wide preferred on v6e/v7x, 128 for v5e alignment; K tiles 512/256/128.
    tn = _choose_inner_tile(N, (256, 128))
    tk = _choose_inner_tile(K, (512, 256, 128))

    grid = (Rp // tm, N // tn, K // tk)
    b2 = b.reshape(1, N)

    out = pl.pallas_call(
        functools.partial(_linear_kernel, apply_relu=apply_relu),
        out_shape=jax.ShapeDtypeStruct((Rp, N), x2.dtype),
        grid_spec=pltpu.PrefetchScalarGridSpec(
            num_scalar_prefetch=0,
            grid=grid,
            in_specs=[
                pl.BlockSpec((tm, tk), lambda i, j, k: (i, k)),   # activations
                pl.BlockSpec((tk, tn), lambda i, j, k: (k, j)),   # weight tile
                pl.BlockSpec((1, tn), lambda i, j, k: (0, j)),    # bias tile
            ],
            out_specs=pl.BlockSpec((tm, tn), lambda i, j, k: (i, j)),
            scratch_shapes=[pltpu.VMEM((tm, tn), jnp.float32)],   # f32 accumulator
        ),
        compiler_params=pltpu.CompilerParams(
            # rows and output-columns are independent; K is the reduction.
            dimension_semantics=("parallel", "parallel", "arbitrary")),
    )(x2, w, b2)

    return out[:R] if Rp != R else out


def mlp_forward(x, weights, biases):
    """x: (B, S, D_in) -> (B, S, D_out).  weights[i]: (in_i, out_i), biases[i]: (out_i,)."""
    B, S, _ = x.shape
    h = x.reshape(B * S, -1)
    n_layers = len(weights)
    for i, (w, b) in enumerate(zip(weights, biases)):
        h = _linear_pallas(h, w, b, apply_relu=(i < n_layers - 1))
    return h.reshape(B, S, weights[-1].shape[1])


def reference(x, weights, biases):
    B, S, _ = x.shape
    h = x.reshape(B * S, -1).astype(jnp.float32)
    for i, (w, b) in enumerate(zip(weights, biases)):
        h = h @ w.astype(jnp.float32) + b.astype(jnp.float32)
        if i < len(weights) - 1:
            h = jnp.maximum(h, 0.0)
    return h.reshape(B, S, -1).astype(x.dtype)


if __name__ == "__main__":
    key = jax.random.PRNGKey(0)

    # Small shapes consistent with the module: MLP(input_dim=32, hidden_dim=64,
    # output_dim=32, num_layers=3) applied to (batch=2, seq=8, input_dim).
    B, S = 2, 8
    input_dim, hidden_dim, output_dim, num_layers = 32, 64, 32, 3
    dims_in = [input_dim] + [hidden_dim] * (num_layers - 1)
    dims_out = [hidden_dim] * (num_layers - 1) + [output_dim]

    kx, key = jax.random.split(key)
    x = jax.random.normal(kx, (B, S, input_dim), dtype=jnp.float32)

    # Deterministic nn.Linear-style init: U(-1/sqrt(fan_in), 1/sqrt(fan_in)).
    weights, biases = [], []
    for d_in, d_out in zip(dims_in, dims_out):
        kw, kb, key = jax.random.split(key, 3)
        bound = 1.0 / (d_in ** 0.5)
        weights.append(jax.random.uniform(kw, (d_in, d_out), minval=-bound,
                                          maxval=bound, dtype=jnp.float32))
        biases.append(jax.random.uniform(kb, (d_out,), minval=-bound,
                                         maxval=bound, dtype=jnp.float32))

    out = mlp_forward(x, weights, biases)
    out = jax.block_until_ready(out)

    ref = reference(x, weights, biases)
    assert out.shape == (B, S, output_dim)
    assert jnp.allclose(out, ref, atol=1e-4, rtol=1e-4), "mismatch vs reference"

    print("KERNEL_OK")
</pallas_src>

<mosaic_0001>
module attributes {stable_mosaic.version = 11 : i64} {
  func.func @_linear_kernel(%arg0: i32, %arg1: i32, %arg2: i32, %arg3: memref<8x32xf32, #tpu.memory_space<vmem>>, %arg4: memref<32x64xf32, #tpu.memory_space<vmem>>, %arg5: memref<1x64xf32, #tpu.memory_space<vmem>>, %arg6: memref<8x64xf32, #tpu.memory_space<vmem>>, %arg7: memref<8x64xf32, #tpu.memory_space<vmem>>) attributes {dimension_semantics = [#tpu.dimension_semantics<parallel>, #tpu.dimension_semantics<parallel>, #tpu.dimension_semantics<arbitrary>], iteration_bounds = array<i64: 2, 1, 1>, scalar_prefetch = 0 : i64, scratch_operands = 1 : i64, tpu.core_type = #tpu.core_type<tc>, window_params = [{transform_indices = @transform_0, window_bounds = array<i64: 8, 32>}, {transform_indices = @transform_1, window_bounds = array<i64: 32, 64>}, {transform_indices = @transform_2, window_bounds = array<i64: 1, 64>}, {transform_indices = @transform_3, window_bounds = array<i64: 8, 64>}]} {
    %c0_i32 = arith.constant 0 : i32
    %0 = arith.cmpi eq, %arg2, %c0_i32 : i32
    %1 = arith.extui %0 : i1 to i32
    %c0_i32_0 = arith.constant 0 : i32
    %2 = arith.cmpi ne, %1, %c0_i32_0 : i32
    scf.if %2 {
      %cst_10 = arith.constant 0.000000e+00 : f32
      %12 = vector.broadcast %cst_10 : f32 to vector<8x64xf32>
      %c0_11 = arith.constant 0 : index
      %c0_12 = arith.constant 0 : index
      %13 = vector.load %arg7[%c0_11, %c0_12] : memref<8x64xf32, #tpu.memory_space<vmem>>, vector<8x64xf32>
      tpu.vector_store %arg7[%c0_11, %c0_12], %12 {strides = array<i32>} : memref<8x64xf32, #tpu.memory_space<vmem>>, vector<8x64xf32>,
    } else {
    }
    %c0 = arith.constant 0 : index
    %c0_1 = arith.constant 0 : index
    %3 = vector.load %arg7[%c0, %c0_1] : memref<8x64xf32, #tpu.memory_space<vmem>>, vector<8x64xf32>
    %c0_2 = arith.constant 0 : index
    %c0_3 = arith.constant 0 : index
    %4 = vector.load %arg3[%c0_2, %c0_3] : memref<8x32xf32, #tpu.memory_space<vmem>>, vector<8x32xf32>
    %c0_4 = arith.constant 0 : index
    %c0_5 = arith.constant 0 : index
    %5 = vector.load %arg4[%c0_4, %c0_5] : memref<32x64xf32, #tpu.memory_space<vmem>>, vector<32x64xf32>
    %cst = arith.constant dense<0.000000e+00> : vector<8x64xf32>
    %6 = tpu.matmul %4, %5, %cst {dimension_numbers = #tpu.dot_dimension_numbers<[1], [0], [0], [1], [0, 0, 1, 1], [], []>} : vector<8x32xf32>, vector<32x64xf32>, vector<8x64xf32> -> vector<8x64xf32>
    %7 = arith.addf %3, %6 : vector<8x64xf32>
    %c0_6 = arith.constant 0 : index
    %c0_7 = arith.constant 0 : index
    %8 = vector.load %arg7[%c0_6, %c0_7] : memref<8x64xf32, #tpu.memory_space<vmem>>, vector<8x64xf32>
    tpu.vector_store %arg7[%c0_6, %c0_7], %7 {strides = array<i32>} : memref<8x64xf32, #tpu.memory_space<vmem>>, vector<8x64xf32>,
    %c0_i32_8 = arith.constant 0 : i32
    %9 = arith.cmpi eq, %arg2, %c0_i32_8 : i32
    %10 = arith.extui %9 : i1 to i32
    %c0_i32_9 = arith.constant 0 : i32
    %11 = arith.cmpi ne, %10, %c0_i32_9 : i32
    scf.if %11 {
      %c0_10 = arith.constant 0 : index
      %c0_11 = arith.constant 0 : index
      %12 = vector.load %arg7[%c0_10, %c0_11] : memref<8x64xf32, #tpu.memory_space<vmem>>, vector<8x64xf32>
      %c0_12 = arith.constant 0 : index
      %c0_13 = arith.constant 0 : index
      %13 = vector.load %arg5[%c0_12, %c0_13] : memref<1x64xf32, #tpu.memory_space<vmem>>, vector<1x64xf32>
      %14 = vector.broadcast %13 : vector<1x64xf32> to vector<8x64xf32>
      %15 = arith.addf %12, %14 : vector<8x64xf32>
      %cst_14 = arith.constant 0.000000e+00 : f32
      %16 = vector.broadcast %cst_14 : f32 to vector<8x64xf32>
      %17 = arith.maximumf %15, %16 : vector<8x64xf32>
      %c0_15 = arith.constant 0 : index
      %c0_16 = arith.constant 0 : index
      %18 = vector.load %arg6[%c0_15, %c0_16] : memref<8x64xf32, #tpu.memory_space<vmem>>, vector<8x64xf32>
      tpu.vector_store %arg6[%c0_15, %c0_16], %17 {strides = array<i32>} : memref<8x64xf32, #tpu.memory_space<vmem>>, vector<8x64xf32>,
    } else {
    }
    return
  }
  func.func @transform_0(%arg0: i32, %arg1: i32, %arg2: i32) -> (i32, i32) {
    %c0_i32 = arith.constant 0 : i32
    return %arg0, %arg2 : i32, i32
  }
  func.func @transform_1(%arg0: i32, %arg1: i32, %arg2: i32) -> (i32, i32) {
    %c0_i32 = arith.constant 0 : i32
    return %arg2, %arg1 : i32, i32
  }
  func.func @transform_2(%arg0: i32, %arg1: i32, %arg2: i32) -> (i32, i32) {
    %c0_i32 = arith.constant 0 : i32
    %c0_i32_0 = arith.constant 0 : i32
    return %c0_i32, %arg1 : i32, i32
  }
  func.func @transform_3(%arg0: i32, %arg1: i32, %arg2: i32) -> (i32, i32) {
    %c0_i32 = arith.constant 0 : i32
    return %arg0, %arg1 : i32, i32
  }
}

</mosaic_0001>

<bundles_post_ra>
// kernel: tpu_custom_call.1
= control target key start
LH: loop header
LB: loop body
LE: loop exit
PB: predicated region body
PF: predicated region fallthrough
CT: control target
= control target key end

     0   :  { %8 = vsyncpa [#allocation4], 0  ;;  %s846_s0 = inlined_call_operand.hbm [shape: f32[16,32], index: 0, kind: input, shape index: {}]   ;;  %s847_s1 = inlined_call_operand.hbm [shape: f32[32,64], index: 1, kind: input, shape index: {}]   ;;  %s848_s2 = inlined_call_operand.vmem [shape: f32[1,64], index: 2, kind: input, shape index: {}]   ;;  %s849_s3 = inlined_call_operand.hbm [shape: f32[16,64], index: 3, kind: output, shape index: {}]  }
   0x1   :  { %10 = vsyncpa [#allocation4 + $0x1], 0 }
   0x2   :  { %11 = vsyncpa [#allocation7], 0 }
   0x3   :  { %12 = vsyncpa [#allocation5], 0 }
   0x4   :  { %14 = vsyncpa [#allocation5 + $0x1], 0  ;;  %s697_s12 = smov 0   ;;  %s699_s13 = smov 0  }
   0x5   :  { %s701_s14 = smov 0   ;;  %s703_s15 = smov 0  }
   0x6   :  { %s705_s16 = smov 0   ;;  %s707_s17 = smov 0  }
   0x7 LB: > { %s431_s18 = sadd.s32 4294967295, %s671_s17   ;;  %p433_p0 = scmp.ge.s32.totalorder %s671_s17, 1  ;;  %s671_s17 = sphi %s707_s17, %s20_s17   ;;  %s667_s16 = sphi %s705_s16, %s860_s16   ;;  %s663_s15 = sphi %s703_s15, %s859_s15   ;;  %s659_s14 = sphi %s701_s14, %s858_s14   ;;  %s655_s13 = sphi %s699_s13, %s857_s13   ;;  %s651_s12 = sphi %s697_s12, %s856_s12  }
   0x8   : > { %p729_p1 = scmp.eq.s32.totalorder %s431_s18, 0  ;;  %p154_p2 = scmp.lt.s32.totalorder %s671_s17, 3 }
   0x9   : > { %s169_s22 = sshll.u32 %s847_s1, 4  ;;  %s673_s24 = smov [#allocation6]   ;;  %s170_s22 = int_to_ptr.hbm [resolvable:$true] %s169_s22 }
   0xa   : > { %p737_p3 = pnand %p433_p0, %p154_p2  ;;  %s171_s25 = sshll.u32 %s673_s24, 4  ;;  %s172_s25 = int_to_ptr.vmem [resolvable:$true] %s171_s25 }
   0xb   : > { %p436_p6 = scmp.ge.s32.totalorder %s671_s17, 2  ;;  %s674_s26 = smov 128  }
   0xc   : > { %p456_p4 = pneg %p737_p3  ;;  %s675_s27 = smov 8  }
   0xd   : > { %s432_s28 = sadd.s32 4294967294, %s671_s17   ;;  %s39_s29 = sadd.s32 1, %s667_s16 }
   0xe   : > { %p457_p5 = pnand %p456_p4, %p729_p1  ;;  %s48_s30 = sadd.s32 1, %s659_s14 }
   0xf   : > { %p41_p7 = scmp.ge.s32.totalorder %s39_s29, 2  ;;  %p55_p8 = scmp.ne.s32.totalorder %s659_s14, %s655_s13 }
  0x10   : > { %459 = dma.hbm_to_vmem [thread:$0]  (!%p457_p5), %s170_s22, 512, %s172_s25, [#allocation7], %s674_s26, %s674_s26, %s675_s27  }
  0x11   : > { %p56_p9 = scmp.eq.s32.totalorder %s671_s17, 0  ;;  %p61_p10 = scmp.ne.s32.totalorder %s655_s13, %s651_s12 }
  0x12   : > { %s862_s29 = smov (%p41_p7, %s39_s29), 0  ;;  %p141_p13 = scmp.eq.s32.totalorder %s431_s18, 1 }
  0x13   : > { %p756_p11 = por %p56_p9, %p55_p8  ;;  %p762_p12 = por %p729_p1, %p61_p10 }
  0x14   : > { %s43_s6 = ssub.s32 %s667_s16, %s862_s29  ;;  %p147_p2 = scmp.eq.s32.totalorder %s432_s28, 1 }
  0x15   : > { %p46_p0 = scmp.eq.s32.totalorder %s43_s6, 0  ;;  %p768_p4 = por %p141_p13, %p55_p8 }
  0x16   : > { %p469_p5 = scmp.lt.s32.totalorder %s671_s17, 2  ;;  %p776_p7 = por %p147_p2, %p61_p10 }
  0x17   : > { %s774_s8 = scalar_select %p46_p0, %s659_s14, %s48_s30  }
  0x18   : > { %s191_s10 = sand.u32 1, %s659_s14   ;;  %s438_s20 = sshll.u32 %s667_s16, 3 }
  0x19   : > { %s437_s11 = sshll.u32 %s191_s10, 3  ;;  %s200_s18 = scalar_lea.hbm %s846_s0, %s438_s20 }
  0x1a   : > { %s195_s24 = scalar_lea.vmem [#allocation3], %s437_s11  ;;  %s202_s26 = sshll.u32 %s200_s18, 4  ;;  %s203_s26 = int_to_ptr.hbm [resolvable:$true] %s202_s26 }
  0x1b   : > { %s204_s25 = sshll.u32 %s195_s24, 4  ;;  %p461_p8 = pnand %p469_p5, %p756_p11  ;;  %s205_s25 = int_to_ptr.vmem [resolvable:$true] %s204_s25 }
  0x1c   : > { %s192_s27 = scalar_lea.sflag [#allocation4], %s191_s10  ;;  %213 = sbr.rel (%p737_p3) target bundleno = 187 (0xbb), region = 32 }
  0x1d   : > { %463 = dma.hbm_to_vmem [thread:$0]  (!%p461_p8), %s203_s26, 128, %s205_s25, %s192_s27  }
  0x1e   : > { %s790_s28 = sand.u32 (!%p737_p3), 1, %s655_s13  }
  0x1f   : > { %s440_s30 = sshll.u32 (!%p737_p3), %s790_s28, 3  ;;  %s216_s6 = scalar_lea.sflag (!%p737_p3), [#allocation4], %s790_s28 }
  0x20   : > { %s219_s11 = scalar_lea.vmem (!%p737_p3), [#allocation3], %s440_s30 }
  0x21   : > { %638 = dma.done.wait (%p762_p12), %s216_s6, 128  }
  0x22   : > { %640 = vsyncadd (%p762_p12), %s216_s6, 4294967168 }
  0x23   : > { %642 = dma.done.wait (%p729_p1), [#allocation7], 512  }
  0x24   : > { %644 = vsyncadd (%p729_p1), [#allocation7], 4294966784  ;;  %vm259_vm0 = vcmask 523264   ;;  %v676_v0 = vmov 0.0   ;;  %v266_v1 = vld [vmem:[#allocation6 + $0x18] sm:$0xff]  ;;  %v265_v2 = vld [vmem:[#allocation6 + $0x10] sm:$0xff] }
  0x25   : > { %260 = vst.msk [vmem:[#allocation2] sm:$0xff] %vm259_vm0, %v676_v0  ;;  %283 = vmatpush.msra.mxu0 %v266_v1  ;;  %v264_v3 = vld [vmem:[#allocation6 + $0x8] sm:$0xff]  ;;  %v263_v4 = vld [vmem:[#allocation6] sm:$0xff]  ;;  %v262_v5 = vld [vmem:[%s219_s11] sm:$0xff]  ;;  %vm267_vm1 = vcmask 261120   ;;  %s445_s19 = sshll.u32 %s663_s15, 3 }
  0x26   : > { %v524_v9 = vld [vmem:[%s848_s2] ss:$0 sm:$0xff]  ;;  %s317_s20 = scalar_lea.hbm %s849_s3, %s445_s19  ;;  %s250_s21 = scalar_lea.vmem [#allocation8], %s440_s30 }
  0x27   : > { %284 = vmatpush.msra.mxu0 %v265_v2  ;;  %s319_s22 = sshll.u32 %s250_s21, 4  ;;  %s321_s18 = sshll.u32 %s317_s20, 4  ;;  %s320_s22 = int_to_ptr.vmem [resolvable:$true] %s319_s22  ;;  %s322_s18 = int_to_ptr.hbm [resolvable:$true] %s321_s18 }
  0x28   : > { %s306_s15 = scalar_lea.sflag [#allocation5], %s790_s28  ;;  %s599_s24 = sshra.s32 %s322_s18, 4  ;;  %s600_s24 = int_to_ptr.hbm [resolvable:$true] %s599_s24 }
  0x29   : > { %285 = vmatpush.msra.mxu0 %v264_v3  ;;  %s601_s25 = scalar_lea.hbm %s600_s24, 8  ;;  %s605_s30 = scalar_lea.hbm %s849_s3, 16 }
  0x2a   : > { %p602_p1 = scmp.ne.s32.totalorder %s600_s24, %s601_s25  ;;  %p606_p10 = scmp.lt.s32.totalorder %s600_s24, %s849_s3 }
  0x2b   : > { %286 = vmatpush.msra.mxu0 %v263_v4  ;;  %p607_p11 = scmp.lt.s32.totalorder %s605_s30, %s601_s25 }
  0x2c   : > { %443 = vmatmul.msk.f32.vlgmr.msra.gmra.mxu0 %vm267_vm1, %v262_v5  ;;  %v261_v6 = vld [vmem:[#allocation2] sm:$0xff]  ;;  %p603_p3 = pnand %p602_p1, %p768_p4 }
  0x2d   : > { %p608_p12 = por %p607_p11, %p606_p10 }
  0x2e   : > { %p604_p9 = pneg %p603_p3 }
  0x30   : > { %p609_p13 = pnand %p608_p12, %p604_p9 }
  0xa9   : > { %v288_v7 = vpop.f32.mrf.mxu0 }
  0xaa   : > { %v291_v8 = vadd.f32 %v288_v7, %v261_v6 }
  0xac   : > { %293 = vst.msk [vmem:[#allocation2] sm:$0xff] %vm259_vm0, %v291_v8 }
  0xb3   : > { %v297_v10 = vld [vmem:[#allocation2] sm:$0xff] }
  0xb4   : > { %v302_v11 = vadd.f32 %v524_v9, %v297_v10 }
  0xb6   : > { %v303_v12 = vmax.f32 %v302_v11, 0.0 }
  0xb8   : > { %304 = vst.msk [vmem:[%s250_s21] sm:$0xff] %vm259_vm0, %v303_v12 }
  0xb9   : > { %612 = shalt.err (!%p609_p13)
}
  0xba   : > { %454 = dma.vmem_to_hbm [thread:$0]  (%p768_p4), %s320_s22, 128, %s322_s18, %s306_s15  }
  0xbb PF: > { %s333_s28 = sand.u32 1, %s651_s12   ;;  %p465_p0 = pnand %p436_p6, %p776_p7 }
  0xbc   : > { %s334_s19 = scalar_lea.sflag [#allocation5], %s333_s28 }
  0xbd   : > { %p466_p2 = pneg %p465_p0 }
  0xbf   : > { %646 = dma.done.wait (%p466_p2), %s334_s19, 128  }
  0xc0   : > { %648 = vsyncadd (%p466_p2), %s334_s19, 4294967168  ;;  %s20_s17 = sadd.s32 1, %s671_s17   ;;  %s856_s12 = smov %s655_s13 }
  0xc1   : > { %p17_p5 = scmp.ge.s32.totalorder %s20_s17, 4   ;;  %s857_s13 = smov %s659_s14 }
  0xc2   : > { %s858_s14 = smov %s774_s8  ;;  %s859_s15 = smov %s667_s16 }
  0xc3   : > { %s860_s16 = smov %s862_s29  ;;  %19 = sbr.rel (!%p17_p5) target bundleno = 7 (0x7), region = 93 }
  0xc8   :  { %340 = vsyncpa [#allocation4], 1 }
  0xc9   :  { %342 = vsyncpa [#allocation4 + $0x1], 1 }
  0xca   :  { %343 = vsyncpa [#allocation7], 1 }
  0xcb   :  { %344 = vsyncpa [#allocation5], 1 }
  0xcc   :  { %346 = vsyncpa [#allocation5 + $0x1], 1 }

</bundles_post_ra>
